<compile_context>
chip_gen: v5e
topology: v5e:2x2
jax: 0.10.0
libtpu: 0.0.40
codegen_flags: <defaults>
</compile_context>

<pallas_src>
import math
from functools import partial

import jax
import jax.numpy as jnp
from jax.experimental import pallas as pl
from jax.experimental.pallas import tpu as pltpu


def _round_up(x, m):
    return ((x + m - 1) // m) * m


# ---------------------------------------------------------------------------
# Pallas kernel: full GNN forward (all batches, all steps) in one invocation.
# ---------------------------------------------------------------------------
def _session_gnn_kernel(
    a_in_ref,      # (R, R)      block-diagonal in-adjacency
    a_out_ref,     # (R, R)      block-diagonal out-adjacency
    h0_ref,        # (R, Hp)     embedded hidden, lane-padded
    w_h_ref,       # (Hp, 5*Hp)  [w_edge_in^T | w_edge_out^T | w_hh^T (gate-padded)]
    w_gi_in_ref,   # (Hp, 3*Hp)  w_ih[:, :H]^T, gate-padded
    w_gi_out_ref,  # (Hp, 3*Hp)  w_ih[:, H:]^T, gate-padded
    bias_ref,      # (8, 5*Hp)   packed biases
    out_ref,       # (R, Hp)
    *, hp, n_steps,
):
    Hp = hp

    a_in = a_in_ref[...]
    a_out = a_out_ref[...]
    w_h = w_h_ref[...]
    w_gi_in = w_gi_in_ref[...]
    w_gi_out = w_gi_out_ref[...]

    # Packed biases (static, 128-aligned slices).
    b_h = bias_ref[0:1, :]                 # (1, 5Hp): b_edge_in | b_edge_out | b_hh
    b_iah = bias_ref[1:2, 0:Hp]            # (1, Hp)
    b_oah = bias_ref[2:3, 0:Hp]            # (1, Hp)
    b_ih = bias_ref[3:4, 0:3 * Hp]         # (1, 3Hp)

    h = h0_ref[...]                        # (R, Hp)

    for _ in range(n_steps):               # step is a small static int -> unrolled
        # One wide matmul produces linear_edge_in(h), linear_edge_out(h) and gh.
        h_all = jnp.dot(h, w_h, preferred_element_type=jnp.float32) + b_h   # (R, 5Hp)
        h_in = h_all[:, 0:Hp]
        h_out = h_all[:, Hp:2 * Hp]
        gh = h_all[:, 2 * Hp:5 * Hp]

        # Adjacency aggregation (block-diagonal == per-batch matmul).
        input_in = jnp.dot(a_in, h_in, preferred_element_type=jnp.float32) + b_iah
        input_out = jnp.dot(a_out, h_out, preferred_element_type=jnp.float32) + b_oah

        # gi = [input_in | input_out] @ w_ih^T + b_ih, without the lane concat.
        gi = (jnp.dot(input_in, w_gi_in, preferred_element_type=jnp.float32)
              + jnp.dot(input_out, w_gi_out, preferred_element_type=jnp.float32)
              + b_ih)                                                        # (R, 3Hp)

        # Gate slices are at 128-lane (vreg) boundaries -> free.
        i_r = gi[:, 0:Hp]
        i_i = gi[:, Hp:2 * Hp]
        i_n = gi[:, 2 * Hp:3 * Hp]
        h_r = gh[:, 0:Hp]
        h_i = gh[:, Hp:2 * Hp]
        h_n = gh[:, 2 * Hp:3 * Hp]

        resetgate = jax.nn.sigmoid(i_r + h_r)
        inputgate = jax.nn.sigmoid(i_i + h_i)
        newgate = jnp.tanh(i_n + resetgate * h_n)
        h = newgate + inputgate * (h - newgate)

    out_ref[...] = h


# ---------------------------------------------------------------------------
# One-time parameter re-layout (pre-transpose, lane-pad, pack biases).
# ---------------------------------------------------------------------------
def prepare_params(params, *, lane=128):
    emb = params["embedding"]
    H = emb.shape[1]
    Hp = _round_up(H, lane)

    def pad_t(w):
        """PyTorch Linear weight (out,in)=(H,H) -> transposed & zero-padded (Hp,Hp)."""
        w_t = w.T
        return jnp.zeros((Hp, Hp), jnp.float32).at[:H, :H].set(w_t)

    def gate_pad_t(w):
        """(3H, in<=H) gate weight -> transposed, gate blocks scattered at Hp offsets."""
        w_t = w.T                                  # (in, 3H)
        out = jnp.zeros((Hp, 3 * Hp), jnp.float32)
        for g in range(3):
            out = out.at[:w_t.shape[0], g * Hp:g * Hp + H].set(w_t[:, g * H:(g + 1) * H])
        return out

    def gate_pad_b(b):
        out = jnp.zeros((3 * Hp,), jnp.float32)
        for g in range(3):
            out = out.at[g * Hp:g * Hp + H].set(b[g * H:(g + 1) * H])
        return out

    # Hidden-side fused weight: h @ w_h -> [h_in | h_out | gh]
    w_h = jnp.concatenate(
        [pad_t(params["w_edge_in"]), pad_t(params["w_edge_out"]),
         gate_pad_t(params["w_hh"])], axis=1)                      # (Hp, 5Hp)

    w_gi_in = gate_pad_t(params["w_ih"][:, :H])                    # (Hp, 3Hp)
    w_gi_out = gate_pad_t(params["w_ih"][:, H:])                   # (Hp, 3Hp)

    # Packed bias slab (one operand instead of six).
    b_hside = jnp.zeros((5 * Hp,), jnp.float32)
    b_hside = b_hside.at[0:H].set(params["b_edge_in"])
    b_hside = b_hside.at[Hp:Hp + H].set(params["b_edge_out"])
    b_hside = b_hside.at[2 * Hp:].set(gate_pad_b(params["b_hh"]))

    biases = jnp.zeros((8, 5 * Hp), jnp.float32)
    biases = biases.at[0, :].set(b_hside)
    biases = biases.at[1, :H].set(params["b_iah"])
    biases = biases.at[2, :H].set(params["b_oah"])
    biases = biases.at[3, :3 * Hp].set(gate_pad_b(params["b_ih"]))

    # Lane-padded embedding table so the lookup directly yields (rows, Hp).
    emb_p = jnp.zeros((emb.shape[0], Hp), jnp.float32).at[:, :H].set(emb)

    return {"embedding": emb_p, "w_h": w_h, "w_gi_in": w_gi_in,
            "w_gi_out": w_gi_out, "biases": biases}


# ---------------------------------------------------------------------------
# SessionGraph.forward: embedding lookup (glue) + GNN steps (single kernel).
# ---------------------------------------------------------------------------
def session_graph_forward(inputs, A, kparams, *, hidden_size, step=1):
    B, N = inputs.shape
    H = hidden_size
    Hp = kparams["w_h"].shape[0]
    R = _round_up(B * N, 8)

    # Embedding lookup (glue); rows padded to a sublane multiple.
    emb_rows = jnp.take(kparams["embedding"], inputs.reshape(-1), axis=0)    # (B*N, Hp)
    h0 = jnp.zeros((R, Hp), jnp.float32).at[:B * N, :].set(emb_rows)

    # Block-diagonal adjacency (layout plumbing): per-batch matmuls become one.
    A_in = A[:, :, :N]
    A_out = A[:, :, N:2 * N]
    eye = jnp.eye(B, dtype=jnp.float32)

    def block_diag(Ab):
        bd = (eye[:, None, :, None] * Ab[:, :, None, :]).reshape(B * N, B * N)
        return jnp.zeros((R, R), jnp.float32).at[:B * N, :B * N].set(bd)

    a_in_bd = block_diag(A_in)
    a_out_bd = block_diag(A_out)

    vmem = pl.BlockSpec(memory_space=pltpu.MemorySpace.VMEM)
    out = pl.pallas_call(
        partial(_session_gnn_kernel, hp=Hp, n_steps=step),
        out_shape=jax.ShapeDtypeStruct((R, Hp), jnp.float32),
        in_specs=[vmem] * 7,
        out_specs=vmem,
    )(a_in_bd, a_out_bd, h0, kparams["w_h"], kparams["w_gi_in"],
      kparams["w_gi_out"], kparams["biases"])

    return out[:B * N, :H].reshape(B, N, H)


# ---------------------------------------------------------------------------
# Pure-JAX reference (mirrors the PyTorch GNNCell exactly).
# ---------------------------------------------------------------------------
def _reference_forward(inputs, A, params, *, step=1):
    hidden = jnp.take(params["embedding"], inputs, axis=0)       # (B, N, H)
    N = inputs.shape[1]
    H = hidden.shape[-1]
    for _ in range(step):
        h_in = hidden @ params["w_edge_in"].T + params["b_edge_in"]
        h_out = hidden @ params["w_edge_out"].T + params["b_edge_out"]
        input_in = jnp.einsum("bnm,bmh->bnh", A[:, :, :N], h_in) + params["b_iah"]
        input_out = jnp.einsum("bnm,bmh->bnh", A[:, :, N:2 * N], h_out) + params["b_oah"]
        ins = jnp.concatenate([input_in, input_out], axis=-1)
        gi = ins @ params["w_ih"].T + params["b_ih"]
        gh = hidden @ params["w_hh"].T + params["b_hh"]
        i_r, i_i, i_n = gi[..., :H], gi[..., H:2 * H], gi[..., 2 * H:]
        h_r, h_i, h_n = gh[..., :H], gh[..., H:2 * H], gh[..., 2 * H:]
        r = jax.nn.sigmoid(i_r + h_r)
        z = jax.nn.sigmoid(i_i + h_i)
        n = jnp.tanh(i_n + r * h_n)
        hidden = n + z * (hidden - n)
    return hidden


# ---------------------------------------------------------------------------
# Deterministic parameter init (matches reset_parameters: U(-stdv, stdv)).
# ---------------------------------------------------------------------------
def init_params(key, n_node, hidden_size):
    H = hidden_size
    stdv = 1.0 / math.sqrt(H)
    names_shapes = [
        ("embedding", (n_node, H)),
        ("w_edge_in", (H, H)), ("b_edge_in", (H,)),
        ("w_edge_out", (H, H)), ("b_edge_out", (H,)),
        ("b_iah", (H,)), ("b_oah", (H,)),
        ("w_ih", (3 * H, 2 * H)), ("b_ih", (3 * H,)),
        ("w_hh", (3 * H, H)), ("b_hh", (3 * H,)),
        # TODO(synk): linear_edge_f is unused by forward(); linear_one/two/three/
        # four/five, linear_transform, linear_text2seq and the loss terms belong
        # to compute_scores / LLM_enhance, not the module's forward(), and are
        # not exercised here.
    ]
    params = {}
    keys = jax.random.split(key, len(names_shapes))
    for k, (name, shape) in zip(keys, names_shapes):
        params[name] = jax.random.uniform(
            k, shape, dtype=jnp.float32, minval=-stdv, maxval=stdv)
    return params


if __name__ == "__main__":
    B, N, H = 2, 8, 32          # batch, unique-nodes-per-session, hiddenSize
    n_node = 50                 # vocabulary size
    step = 1                    # opt.step

    key = jax.random.PRNGKey(0)
    k_par, k_inp, k_a = jax.random.split(key, 3)

    params = init_params(k_par, n_node, H)
    inputs = jax.random.randint(k_inp, (B, N), minval=0, maxval=n_node, dtype=jnp.int32)
    # Synthetic normalized adjacency [A_in | A_out], shape (B, N, 2N).
    A = jax.random.uniform(k_a, (B, N, 2 * N), dtype=jnp.float32)
    A = A / jnp.maximum(jnp.sum(A, axis=1, keepdims=True), 1e-6)

    kparams = prepare_params(params)          # one-time weight re-layout
    fwd = jax.jit(partial(session_graph_forward, hidden_size=H, step=step))
    hidden = fwd(inputs, A, kparams)
    jax.block_until_ready(hidden)

    ref = _reference_forward(inputs, A, params, step=step)
    err = float(jnp.max(jnp.abs(hidden - ref)))

    assert hidden.shape == (B, N, H) and hidden.dtype == jnp.float32
    assert err < 1e-3, f"mismatch vs reference: {err}"
    print("KERNEL_OK")
</pallas_src>

<mosaic_0001>
module attributes {stable_mosaic.version = 11 : i64} {
  func.func @_session_gnn_kernel(%arg0: memref<16x16xf32, #tpu.memory_space<vmem>>, %arg1: memref<16x16xf32, #tpu.memory_space<vmem>>, %arg2: memref<16x128xf32, #tpu.memory_space<vmem>>, %arg3: memref<128x640xf32, #tpu.memory_space<vmem>>, %arg4: memref<128x384xf32, #tpu.memory_space<vmem>>, %arg5: memref<128x384xf32, #tpu.memory_space<vmem>>, %arg6: memref<8x640xf32, #tpu.memory_space<vmem>>, %arg7: memref<16x128xf32, #tpu.memory_space<vmem>>) attributes {dimension_semantics = [], scalar_prefetch = 0 : i64, scratch_operands = 0 : i64, tpu.core_type = #tpu.core_type<tc>} {
    %c0 = arith.constant 0 : index
    %c0_0 = arith.constant 0 : index
    %0 = vector.load %arg0[%c0, %c0_0] : memref<16x16xf32, #tpu.memory_space<vmem>>, vector<16x16xf32>
    %c0_1 = arith.constant 0 : index
    %c0_2 = arith.constant 0 : index
    %1 = vector.load %arg1[%c0_1, %c0_2] : memref<16x16xf32, #tpu.memory_space<vmem>>, vector<16x16xf32>
    %c0_3 = arith.constant 0 : index
    %c0_4 = arith.constant 0 : index
    %2 = vector.load %arg3[%c0_3, %c0_4] : memref<128x640xf32, #tpu.memory_space<vmem>>, vector<128x640xf32>
    %c0_5 = arith.constant 0 : index
    %c0_6 = arith.constant 0 : index
    %3 = vector.load %arg4[%c0_5, %c0_6] : memref<128x384xf32, #tpu.memory_space<vmem>>, vector<128x384xf32>
    %c0_7 = arith.constant 0 : index
    %c0_8 = arith.constant 0 : index
    %4 = vector.load %arg5[%c0_7, %c0_8] : memref<128x384xf32, #tpu.memory_space<vmem>>, vector<128x384xf32>
    %c0_9 = arith.constant 0 : index
    %c0_10 = arith.constant 0 : index
    %5 = vector.load %arg6[%c0_9, %c0_10] : memref<8x640xf32, #tpu.memory_space<vmem>>, vector<1x640xf32>
    %c1 = arith.constant 1 : index
    %c0_11 = arith.constant 0 : index
    %6 = vector.load %arg6[%c1, %c0_11] : memref<8x640xf32, #tpu.memory_space<vmem>>, vector<1x128xf32>
    %c2 = arith.constant 2 : index
    %c0_12 = arith.constant 0 : index
    %7 = vector.load %arg6[%c2, %c0_12] : memref<8x640xf32, #tpu.memory_space<vmem>>, vector<1x128xf32>
    %c3 = arith.constant 3 : index
    %c0_13 = arith.constant 0 : index
    %8 = vector.load %arg6[%c3, %c0_13] : memref<8x640xf32, #tpu.memory_space<vmem>>, vector<1x384xf32>
    %c0_14 = arith.constant 0 : index
    %c0_15 = arith.constant 0 : index
    %9 = vector.load %arg2[%c0_14, %c0_15] : memref<16x128xf32, #tpu.memory_space<vmem>>, vector<16x128xf32>
    %cst = arith.constant dense<0.000000e+00> : vector<16x640xf32>
    %10 = tpu.matmul %9, %2, %cst {dimension_numbers = #tpu.dot_dimension_numbers<[1], [0], [0], [1], [0, 0, 1, 1], [], []>} : vector<16x128xf32>, vector<128x640xf32>, vector<16x640xf32> -> vector<16x640xf32>
    %11 = vector.broadcast %5 : vector<1x640xf32> to vector<16x640xf32>
    %12 = arith.addf %10, %11 : vector<16x640xf32>
    %13 = vector.extract_strided_slice %12 {offsets = [0, 0], sizes = [16, 128], strides = [1, 1]} : vector<16x640xf32> to vector<16x128xf32>
    %14 = vector.extract_strided_slice %12 {offsets = [0, 128], sizes = [16, 128], strides = [1, 1]} : vector<16x640xf32> to vector<16x128xf32>
    %15 = vector.extract_strided_slice %12 {offsets = [0, 256], sizes = [16, 384], strides = [1, 1]} : vector<16x640xf32> to vector<16x384xf32>
    %cst_16 = arith.constant dense<0.000000e+00> : vector<16x128xf32>
    %16 = tpu.matmul %0, %13, %cst_16 {dimension_numbers = #tpu.dot_dimension_numbers<[1], [0], [0], [1], [0, 0, 1, 1], [], []>} : vector<16x16xf32>, vector<16x128xf32>, vector<16x128xf32> -> vector<16x128xf32>
    %17 = vector.broadcast %6 : vector<1x128xf32> to vector<16x128xf32>
    %18 = arith.addf %16, %17 : vector<16x128xf32>
    %cst_17 = arith.constant dense<0.000000e+00> : vector<16x128xf32>
    %19 = tpu.matmul %1, %14, %cst_17 {dimension_numbers = #tpu.dot_dimension_numbers<[1], [0], [0], [1], [0, 0, 1, 1], [], []>} : vector<16x16xf32>, vector<16x128xf32>, vector<16x128xf32> -> vector<16x128xf32>
    %20 = vector.broadcast %7 : vector<1x128xf32> to vector<16x128xf32>
    %21 = arith.addf %19, %20 : vector<16x128xf32>
    %cst_18 = arith.constant dense<0.000000e+00> : vector<16x384xf32>
    %22 = tpu.matmul %18, %3, %cst_18 {dimension_numbers = #tpu.dot_dimension_numbers<[1], [0], [0], [1], [0, 0, 1, 1], [], []>} : vector<16x128xf32>, vector<128x384xf32>, vector<16x384xf32> -> vector<16x384xf32>
    %cst_19 = arith.constant dense<0.000000e+00> : vector<16x384xf32>
    %23 = tpu.matmul %21, %4, %cst_19 {dimension_numbers = #tpu.dot_dimension_numbers<[1], [0], [0], [1], [0, 0, 1, 1], [], []>} : vector<16x128xf32>, vector<128x384xf32>, vector<16x384xf32> -> vector<16x384xf32>
    %24 = arith.addf %22, %23 : vector<16x384xf32>
    %25 = vector.broadcast %8 : vector<1x384xf32> to vector<16x384xf32>
    %26 = arith.addf %24, %25 : vector<16x384xf32>
    %27 = vector.extract_strided_slice %26 {offsets = [0, 0], sizes = [16, 128], strides = [1, 1]} : vector<16x384xf32> to vector<16x128xf32>
    %28 = vector.extract_strided_slice %26 {offsets = [0, 128], sizes = [16, 128], strides = [1, 1]} : vector<16x384xf32> to vector<16x128xf32>
    %29 = vector.extract_strided_slice %26 {offsets = [0, 256], sizes = [16, 128], strides = [1, 1]} : vector<16x384xf32> to vector<16x128xf32>
    %30 = vector.extract_strided_slice %15 {offsets = [0, 0], sizes = [16, 128], strides = [1, 1]} : vector<16x384xf32> to vector<16x128xf32>
    %31 = vector.extract_strided_slice %15 {offsets = [0, 128], sizes = [16, 128], strides = [1, 1]} : vector<16x384xf32> to vector<16x128xf32>
    %32 = vector.extract_strided_slice %15 {offsets = [0, 256], sizes = [16, 128], strides = [1, 1]} : vector<16x384xf32> to vector<16x128xf32>
    %33 = arith.addf %27, %30 : vector<16x128xf32>
    %34 = arith.negf %33 : vector<16x128xf32>
    %35 = math.exp %34 : vector<16x128xf32>
    %cst_20 = arith.constant 1.000000e+00 : f32
    %36 = vector.broadcast %cst_20 : f32 to vector<16x128xf32>
    %37 = arith.addf %36, %35 : vector<16x128xf32>
    %38 = arith.divf %36, %37 : vector<16x128xf32>
    %39 = arith.addf %28, %31 : vector<16x128xf32>
    %40 = arith.negf %39 : vector<16x128xf32>
    %41 = math.exp %40 : vector<16x128xf32>
    %cst_21 = arith.constant 1.000000e+00 : f32
    %42 = vector.broadcast %cst_21 : f32 to vector<16x128xf32>
    %43 = arith.addf %42, %41 : vector<16x128xf32>
    %44 = arith.divf %42, %43 : vector<16x128xf32>
    %45 = arith.mulf %38, %32 : vector<16x128xf32>
    %46 = arith.addf %29, %45 : vector<16x128xf32>
    %47 = math.tanh %46 : vector<16x128xf32>
    %48 = arith.subf %9, %47 : vector<16x128xf32>
    %49 = arith.mulf %44, %48 : vector<16x128xf32>
    %50 = arith.addf %47, %49 : vector<16x128xf32>
    %c0_22 = arith.constant 0 : index
    %c0_23 = arith.constant 0 : index
    %51 = vector.load %arg7[%c0_22, %c0_23] : memref<16x128xf32, #tpu.memory_space<vmem>>, vector<16x128xf32>
    tpu.vector_store %arg7[%c0_22, %c0_23], %50 {strides = array<i32>} : memref<16x128xf32, #tpu.memory_space<vmem>>, vector<16x128xf32>,
    return
  }
}

</mosaic_0001>

<bundles_post_ra>
// kernel: session_graph_forward.1
= control target key start
LH: loop header
LB: loop body
LE: loop exit
PB: predicated region body
PF: predicated region fallthrough
CT: control target
= control target key end

     0   :  { %12 = vsyncpa [#allocation3], 0  ;;  %s946_s0 = inlined_call_operand.vmem [shape: f32[16,16], index: 0, kind: input, shape index: {}]   ;;  %s947_s1 = inlined_call_operand.vmem [shape: f32[16,16], index: 1, kind: input, shape index: {}]   ;;  %s948_s2 = inlined_call_operand.vmem [shape: f32[16,128], index: 2, kind: input, shape index: {}]   ;;  %s949_s3 = inlined_call_operand.hbm [shape: f32[128,640], index: 3, kind: input, shape index: {}]   ;;  %s950_s4 = inlined_call_operand.hbm [shape: f32[128,384], index: 4, kind: input, shape index: {}]   ;;  %s951_s5 = inlined_call_operand.hbm [shape: f32[128,384], index: 5, kind: input, shape index: {}]   ;;  %s952_s6 = inlined_call_operand.vmem [shape: f32[8,640], index: 6, kind: input, shape index: {}]   ;;  %s953_s7 = inlined_call_operand.vmem [shape: f32[16,128], index: 7, kind: output, shape index: {}]  }
   0x1   :  { %13 = vsyncpa [#allocation5], 0  ;;  %s37_s26 = sshll.u32 %s950_s4, 4  ;;  %s810_s27 = smov [#allocation4]   ;;  %s38_s26 = int_to_ptr.hbm [resolvable:$true] %s37_s26 }
   0x2   :  { %s39_s28 = sshll.u32 %s810_s27, 4  ;;  %s24_s8 = sshll.u32 %s949_s3, 4  ;;  %s40_s28 = int_to_ptr.vmem [resolvable:$true] %s39_s28  ;;  %s25_s8 = int_to_ptr.hbm [resolvable:$true] %s24_s8 }
   0x3   :  { %s811_s9 = smov 384   ;;  %s812_s10 = smov 24  }
   0x4   :  { %45 = dma.hbm_to_vmem [thread:$0]  %s38_s26, 6144, %s40_s28, [#allocation5], %s811_s9, %s811_s9, %s812_s10  }
   0x5   :  { %s813_s11 = smov [#allocation2]   ;;  %s814_s13 = smov 640  }
   0x6   :  { %s26_s12 = sshll.u32 %s813_s11, 4  ;;  %s815_s14 = smov 40   ;;  %s27_s12 = int_to_ptr.vmem [resolvable:$true] %s26_s12 }
   0x7   :  { %32 = dma.hbm_to_vmem [thread:$0]  %s25_s8, 10240, %s27_s12, [#allocation3], %s814_s13, %s814_s13, %s815_s14  }
   0x8   :  { %s50_s16 = sshll.u32 %s951_s5, 4  ;;  %s816_s17 = smov [#allocation6]   ;;  %s51_s16 = int_to_ptr.hbm [resolvable:$true] %s50_s16 }
   0x9   :  { %s52_s18 = sshll.u32 %s816_s17, 4  ;;  %s53_s18 = int_to_ptr.vmem [resolvable:$true] %s52_s18 }
   0xa   :  { %58 = dma.hbm_to_vmem [thread:$0]  %s51_s16, 6144, %s53_s18, [#allocation5], %s811_s9, %s811_s9, %s812_s10  }
   0xb   :  { %806 = dma.done.wait [#allocation3], 10240  }
   0xc   :  { %807 = vsyncadd [#allocation3], 4294957056 }
   0xd   :  { %808 = dma.done.wait [#allocation5], 12288  }
   0xe   :  { %809 = vsyncadd [#allocation5], 4294955008  ;;  %v152_v0 = vld [vmem:[#allocation2 + $0x258] sm:$0xff]  ;;  %v147_v1 = vld [vmem:[#allocation2 + $0x230] sm:$0xff]  ;;  %vm388_vm0 = vcmask 130048  }
   0xf   :  { %273 = vmatpush.msra.mxu0 %v152_v0  ;;  %v153_v2 = vld [vmem:[#allocation2 + $0x260] sm:$0xff]  ;;  %v142_v3 = vld [vmem:[#allocation2 + $0x208] sm:$0xff]  ;;  %v148_v4 = vld [vmem:[#allocation2 + $0x238] sm:$0xff] }
  0x10   :  { %296 = vmatpush.msra.mxu1 %v153_v2  ;;  %v143_v5 = vld [vmem:[#allocation2 + $0x210] sm:$0xff]  ;;  %v137_v6 = vld [vmem:[#allocation2 + $0x1e0] sm:$0xff]  ;;  %v138_v7 = vld [vmem:[#allocation2 + $0x1e8] sm:$0xff] }
  0x11   :  { %274 = vmatpush.msra.mxu0 %v147_v1  ;;  %v132_v8 = vld [vmem:[#allocation2 + $0x1b8] sm:$0xff]  ;;  %v133_v9 = vld [vmem:[#allocation2 + $0x1c0] sm:$0xff]  ;;  %v127_v10 = vld [vmem:[#allocation2 + $0x190] sm:$0xff] }
  0x12   :  { %297 = vmatpush.msra.mxu1 %v148_v4  ;;  %v128_v11 = vld [vmem:[#allocation2 + $0x198] sm:$0xff]  ;;  %v122_v12 = vld [vmem:[#allocation2 + $0x168] sm:$0xff]  ;;  %v123_v13 = vld [vmem:[#allocation2 + $0x170] sm:$0xff] }
  0x13   :  { %275 = vmatpush.msra.mxu0 %v142_v3  ;;  %v154_v14 = vld [vmem:[#allocation2 + $0x268] sm:$0xff]  ;;  %v149_v15 = vld [vmem:[#allocation2 + $0x240] sm:$0xff]  ;;  %v144_v18 = vld [vmem:[#allocation2 + $0x218] sm:$0xff] }
  0x14   :  { %298 = vmatpush.msra.mxu1 %v143_v5  ;;  %v117_v16 = vld [vmem:[#allocation2 + $0x140] sm:$0xff]  ;;  %319 = vmatpush.msra.mxu2 %v154_v14  ;;  %v118_v17 = vld [vmem:[#allocation2 + $0x148] sm:$0xff]  ;;  %v112_v19 = vld [vmem:[#allocation2 + $0x118] sm:$0xff] }
  0x15   :  { %276 = vmatpush.msra.mxu0 %v137_v6  ;;  %v113_v20 = vld [vmem:[#allocation2 + $0x120] sm:$0xff]  ;;  %v139_v21 = vld [vmem:[#allocation2 + $0x1f0] sm:$0xff]  ;;  %v108_v23 = vld [vmem:[#allocation2 + $0xf8] sm:$0xff] }
  0x16   :  { %299 = vmatpush.msra.mxu1 %v138_v7  ;;  %320 = vmatpush.msra.mxu2 %v149_v15  ;;  %v107_v22 = vld [vmem:[#allocation2 + $0xf0] sm:$0xff]  ;;  %v134_v24 = vld [vmem:[#allocation2 + $0x1c8] sm:$0xff]  ;;  %v129_v27 = vld [vmem:[#allocation2 + $0x1a0] sm:$0xff] }
  0x17   :  { %277 = vmatpush.msra.mxu0 %v132_v8  ;;  %v102_v25 = vld [vmem:[#allocation2 + $0xc8] sm:$0xff]  ;;  %v103_v26 = vld [vmem:[#allocation2 + $0xd0] sm:$0xff]  ;;  %v97_v28 = vld [vmem:[#allocation2 + $0xa0] sm:$0xff] }
  0x18   :  { %300 = vmatpush.msra.mxu1 %v133_v9  ;;  %321 = vmatpush.msra.mxu2 %v144_v18  ;;  %v98_v29 = vld [vmem:[#allocation2 + $0xa8] sm:$0xff]  ;;  %v124_v30 = vld [vmem:[#allocation2 + $0x178] sm:$0xff]  ;;  %v93_v32 = vld [vmem:[#allocation2 + $0x80] sm:$0xff] }
  0x19   :  { %278 = vmatpush.msra.mxu0 %v127_v10  ;;  %v92_v31 = vld [vmem:[#allocation2 + $0x78] sm:$0xff]  ;;  %v119_v33 = vld [vmem:[#allocation2 + $0x150] sm:$0xff]  ;;  %v114_v36 = vld [vmem:[#allocation2 + $0x128] sm:$0xff] }
  0x1a   :  { %301 = vmatpush.msra.mxu1 %v128_v11  ;;  %322 = vmatpush.msra.mxu2 %v139_v21  ;;  %v87_v34 = vld [vmem:[#allocation2 + $0x50] sm:$0xff]  ;;  %v88_v35 = vld [vmem:[#allocation2 + $0x58] sm:$0xff]  ;;  %v82_v37 = vld [vmem:[#allocation2 + $0x28] sm:$0xff] }
  0x1b   :  { %279 = vmatpush.msra.mxu0 %v122_v12  ;;  %v83_v38 = vld [vmem:[#allocation2 + $0x30] sm:$0xff]  ;;  %v109_v39 = vld [vmem:[#allocation2 + $0x100] sm:$0xff]  ;;  %v78_v42 = vld [vmem:[#allocation2 + $0x8] sm:$0xff] }
  0x1c   :  { %302 = vmatpush.msra.mxu1 %v123_v13  ;;  %323 = vmatpush.msra.mxu2 %v134_v24  ;;  %v77_v40 = vld [vmem:[#allocation2] sm:$0xff]  ;;  %v104_v43 = vld [vmem:[#allocation2 + $0xd8] sm:$0xff]  ;;  %v99_v44 = vld [vmem:[#allocation2 + $0xb0] sm:$0xff] }
  0x1d   :  { %280 = vmatpush.msra.mxu0 %v117_v16  ;;  %v869_v41 = vld [vmem:[%s948_s2] sm:$0xff]  ;;  %v94_v45 = vld [vmem:[#allocation2 + $0x88] sm:$0xff]  ;;  %v84_v48 = vld [vmem:[#allocation2 + $0x38] sm:$0xff] }
  0x1e   :  { %303 = vmatpush.msra.mxu1 %v118_v17  ;;  %324 = vmatpush.msra.mxu2 %v129_v27  ;;  %v89_v46 = vld [vmem:[#allocation2 + $0x60] sm:$0xff]  ;;  %v876_v47 = vld [vmem:[%s948_s2 + $0x8] sm:$0xff]  ;;  %v79_v49 = vld [vmem:[#allocation2 + $0x10] sm:$0xff] }
  0x1f   :  { %281 = vmatpush.msra.mxu0 %v112_v19  ;;  %v253_v50 = vld [vmem:[%s952_s6] ss:$8 sm:$0xf] }
  0x20   :  { %304 = vmatpush.msra.mxu1 %v113_v20  ;;  %325 = vmatpush.msra.mxu2 %v124_v30  ;;  %v254_v51 = vld [vmem:[%s952_s6] ss:$8 sm:$0x10]  ;;  %v155_v55 = vld [vmem:[#allocation2 + $0x270] sm:$0xff]  ;;  %v150_v56 = vld [vmem:[#allocation2 + $0x248] sm:$0xff] }
  0x21   :  { %282 = vmatpush.msra.mxu0 %v107_v22  ;;  %v888_v54 = vor.u32 %v254_v51, %v253_v50  ;;  %342 = vmatpush.msra.mxu3 %v155_v55  ;;  %v145_v60 = vld [vmem:[#allocation2 + $0x220] sm:$0xff]  ;;  %v156_v61 = vld [vmem:[#allocation2 + $0x278] sm:$0xff]  ;;  %v151_v0 = vld [vmem:[#allocation2 + $0x250] sm:$0xff] }
  0x22   :  { %305 = vmatpush.msra.mxu1 %v108_v23  ;;  %326 = vmatpush.msra.mxu2 %v119_v33  ;;  %v140_v1 = vld [vmem:[#allocation2 + $0x1f8] sm:$0xff]  ;;  %v73_v4 = vld [vmem:[%s946_s0] sm:$0xff]  ;;  %v146_v5 = vld [vmem:[#allocation2 + $0x228] sm:$0xff] }
  0x23   :  { %283 = vmatpush.msra.mxu0 %v102_v25  ;;  %v263_v57 = vperm.slane %v888_v54, 0  ;;  %v264_v58 = vperm.slane %v888_v54, 1  ;;  %343 = vmatpush.msra.mxu3 %v150_v56  ;;  %v135_v6 = vld [vmem:[#allocation2 + $0x1d0] sm:$0xff]  ;;  %v141_v8 = vld [vmem:[#allocation2 + $0x200] sm:$0xff]  ;;  %v130_v9 = vld [vmem:[#allocation2 + $0x1a8] sm:$0xff] }
  0x24   :  { %306 = vmatpush.msra.mxu1 %v103_v26  ;;  %327 = vmatpush.msra.mxu2 %v114_v36  ;;  %v136_v10 = vld [vmem:[#allocation2 + $0x1d8] sm:$0xff]  ;;  %v251_v11 = vld [vmem:[#allocation6 + $0x170] sm:$0xff]  ;;  %v125_v12 = vld [vmem:[#allocation2 + $0x180] sm:$0xff] }
  0x25   :  { %284 = vmatpush.msra.mxu0 %v97_v28  ;;  %344 = vmatpush.msra.mxu3 %v145_v60  ;;  %v248_v13 = vld [vmem:[#allocation6 + $0x158] sm:$0xff]  ;;  %v131_v14 = vld [vmem:[#allocation2 + $0x1b0] sm:$0xff]  ;;  %v245_v15 = vld [vmem:[#allocation6 + $0x140] sm:$0xff] }
  0x26   :  { %307 = vmatpush.msra.mxu1 %v98_v29  ;;  %328 = vmatpush.msra.mxu2 %v109_v39  ;;  %v120_v16 = vld [vmem:[#allocation2 + $0x158] sm:$0xff]  ;;  %v74_v17 = vld [vmem:[%s946_s0 + $0x8] sm:$0xff]  ;;  %v115_v19 = vld [vmem:[#allocation2 + $0x130] sm:$0xff] }
  0x27   :  { %285 = vmatpush.msra.mxu0 %v92_v31  ;;  %345 = vmatpush.msra.mxu3 %v140_v1  ;;  %v126_v18 = vld [vmem:[#allocation2 + $0x188] sm:$0xff]  ;;  %v121_v21 = vld [vmem:[#allocation2 + $0x160] sm:$0xff]  ;;  %v239_v23 = vld [vmem:[#allocation6 + $0x110] sm:$0xff] }
  0x28   :  { %308 = vmatpush.msra.mxu1 %v93_v32  ;;  %329 = vmatpush.msra.mxu2 %v104_v43  ;;  %v242_v20 = vld [vmem:[#allocation6 + $0x128] sm:$0xff]  ;;  %v116_v24 = vld [vmem:[#allocation2 + $0x138] sm:$0xff]  ;;  %v105_v25 = vld [vmem:[#allocation2 + $0xe0] sm:$0xff] }
  0x29   :  { %286 = vmatpush.msra.mxu0 %v87_v34  ;;  %346 = vmatpush.msra.mxu3 %v135_v6  ;;  %v110_v22 = vld [vmem:[#allocation2 + $0x108] sm:$0xff]  ;;  %v236_v26 = vld [vmem:[#allocation6 + $0xf8] sm:$0xff]  ;;  %v111_v27 = vld [vmem:[#allocation2 + $0x110] sm:$0xff] }
  0x2a   :  { %309 = vmatpush.msra.mxu1 %v88_v35  ;;  %330 = vmatpush.msra.mxu2 %v99_v44  ;;  %v100_v28 = vld [vmem:[#allocation2 + $0xb8] sm:$0xff]  ;;  %v233_v29 = vld [vmem:[#allocation6 + $0xe0] sm:$0xff]  ;;  %v106_v31 = vld [vmem:[#allocation2 + $0xe8] sm:$0xff] }
  0x2b   :  { %287 = vmatpush.msra.mxu0 %v82_v37  ;;  %347 = vmatpush.msra.mxu3 %v130_v9  ;;  %v75_v30 = vld [vmem:[%s947_s1] sm:$0xff]  ;;  %v95_v32 = vld [vmem:[#allocation2 + $0x90] sm:$0xff]  ;;  %v230_v33 = vld [vmem:[#allocation6 + $0xc8] sm:$0xff] }
  0x2c   :  { %310 = vmatpush.msra.mxu1 %v83_v38  ;;  %331 = vmatpush.msra.mxu2 %v94_v45  ;;  %v101_v34 = vld [vmem:[#allocation2 + $0xc0] sm:$0xff]  ;;  %v90_v35 = vld [vmem:[#allocation2 + $0x68] sm:$0xff]  ;;  %v227_v36 = vld [vmem:[#allocation6 + $0xb0] sm:$0xff] }
  0x2d   :  { %288 = vmatpush.msra.mxu0 %v77_v40  ;;  %348 = vmatpush.msra.mxu3 %v125_v12  ;;  %v252_v37 = vld [vmem:[#allocation6 + $0x178] sm:$0xff]  ;;  %v85_v39 = vld [vmem:[#allocation2 + $0x40] sm:$0xff]  ;;  %v76_v45 = vld [vmem:[%s947_s1 + $0x8] sm:$0xff] }
  0x2e   :  { %289 = vmatmul.f32.vlgmr.msra.gmra.mxu0 %v869_v41  ;;  %311 = vmatpush.msra.mxu1 %v78_v42  ;;  %v96_v38 = vld [vmem:[#allocation2 + $0x98] sm:$0xff]  ;;  %v91_v42 = vld [vmem:[#allocation2 + $0x70] sm:$0xff]  ;;  %v221_v44 = vld [vmem:[#allocation6 + $0x80] sm:$0xff] }
  0x2f   :  { %312 = vmatmul.f32.vlgmr.msra.gmra.mxu1 %v869_v41  ;;  %332 = vmatpush.msra.mxu2 %v89_v46  ;;  %v224_v40 = vld [vmem:[#allocation6 + $0x98] sm:$0xff]  ;;  %v250_v46 = vld [vmem:[#allocation6 + $0x168] sm:$0xff]  ;;  %v247_v50 = vld [vmem:[#allocation6 + $0x150] sm:$0xff] }
  0x30   :  { %365 = vmatpush.msrb.mxu0 %v156_v61  ;;  %470 = vmatpush.msrb.mxu1 %v251_v11  ;;  %v80_v43 = vld [vmem:[#allocation2 + $0x18] sm:$0xff]  ;;  %v81_v51 = vld [vmem:[#allocation2 + $0x20] sm:$0xff]  ;;  %v202_v55 = vld [vmem:[#allocation4 + $0x168] sm:$0xff] }
  0x31   :  { %333 = vmatpush.msra.mxu2 %v84_v48  ;;  %349 = vmatpush.msra.mxu3 %v120_v16  ;;  %v86_v48 = vld [vmem:[#allocation2 + $0x48] sm:$0xff]  ;;  %v212_v56 = vld [vmem:[#allocation6 + $0x38] sm:$0xff]  ;;  %v235_v61 = vld [vmem:[#allocation6 + $0xf0] sm:$0xff] }
  0x32   :  { %366 = vmatpush.msrb.mxu0 %v151_v0  ;;  %471 = vmatpush.msrb.mxu1 %v248_v13  ;;  %v196_v60 = vld [vmem:[#allocation4 + $0x138] sm:$0xff]  ;;  %v190_v0 = vld [vmem:[#allocation4 + $0x108] sm:$0xff]  ;;  %v229_v1 = vld [vmem:[#allocation6 + $0xc0] sm:$0xff] }
  0x33   :  { %334 = vmatpush.msra.mxu2 %v79_v49  ;;  %350 = vmatpush.msra.mxu3 %v115_v19  ;;  %v218_v49 = vld [vmem:[#allocation6 + $0x68] sm:$0xff]  ;;  %v181_v6 = vld [vmem:[#allocation4 + $0xc0] sm:$0xff]  ;;  %v175_v13 = vld [vmem:[#allocation4 + $0x90] sm:$0xff] }
  0x34   :  { %335 = vmatmul.f32.vlgmr.msra.gmra.mxu2 %v869_v41  ;;  %367 = vmatpush.msrb.mxu0 %v146_v5  ;;  %v223_v5 = vld [vmem:[#allocation6 + $0x90] sm:$0xff]  ;;  %v214_v9 = vld [vmem:[#allocation6 + $0x48] sm:$0xff]  ;;  %v249_v12 = vld [vmem:[#allocation6 + $0x160] sm:$0xff] }
  0x35   :  { %472 = vmatpush.msrb.mxu1 %v245_v15  ;;  %351 = vmatpush.msra.mxu3 %v110_v22  ;;  %v178_v11 = vld [vmem:[#allocation4 + $0xa8] sm:$0xff]  ;;  %v172_v15 = vld [vmem:[#allocation4 + $0x78] sm:$0xff]  ;;  %v243_v16 = vld [vmem:[#allocation6 + $0x130] sm:$0xff] }
  0x36   :  { %292 = vmatmul.f32.gmra.mxu0 %v876_v47  ;;  %v166_v19 = vld [vmem:[#allocation4 + $0x48] sm:$0xff] }
  0x37   :  { %315 = vmatmul.f32.gmra.mxu1 %v876_v47  ;;  %368 = vmatpush.msrb.mxu0 %v141_v8  ;;  %v217_v8 = vld [vmem:[#allocation6 + $0x60] sm:$0xff]  ;;  %v234_v22 = vld [vmem:[#allocation6 + $0xe8] sm:$0xff] }
  0x38   :  { %473 = vmatpush.msrb.mxu1 %v242_v20  ;;  %352 = vmatpush.msra.mxu3 %v105_v25  ;;  %v237_v20 = vld [vmem:[#allocation6 + $0x100] sm:$0xff] }
  0x39   :  { %369 = vmatpush.msrb.mxu0 %v136_v10  ;;  %v211_v10 = vld [vmem:[#allocation6 + $0x30] sm:$0xff]  ;;  %v209_v25 = vld [vmem:[#allocation6 + $0x20] sm:$0xff] }
  0x3a   :  { %474 = vmatpush.msrb.mxu1 %v239_v23  ;;  %353 = vmatpush.msra.mxu3 %v100_v28  ;;  %v160_v23 = vld [vmem:[#allocation4 + $0x18] sm:$0xff]  ;;  %v203_v28 = vld [vmem:[#allocation4 + $0x170] sm:$0xff] }
  0x3b   :  { %370 = vmatpush.msrb.mxu0 %v131_v14  ;;  %v246_v14 = vld [vmem:[#allocation6 + $0x148] sm:$0xff] }
  0x3c   :  { %338 = vmatmul.f32.gmra.mxu2 %v876_v47  ;;  %475 = vmatpush.msrb.mxu1 %v236_v26  ;;  %v205_v26 = vld [vmem:[#allocation6] sm:$0xff] }
  0x3d   :  { %371 = vmatpush.msrb.mxu0 %v126_v18  ;;  %354 = vmatpush.msra.mxu3 %v95_v32  ;;  %v240_v18 = vld [vmem:[#allocation6 + $0x118] sm:$0xff]  ;;  %v231_v32 = vld [vmem:[#allocation6 + $0xd0] sm:$0xff] }
  0x3e   :  { %476 = vmatpush.msrb.mxu1 %v233_v29  ;;  %v204_v29 = vld [vmem:[#allocation4 + $0x178] sm:$0xff] }
  0x3f   :  { %372 = vmatpush.msrb.mxu0 %v121_v21  ;;  %355 = vmatpush.msra.mxu3 %v90_v35  ;;  %v163_v21 = vld [vmem:[#allocation4 + $0x30] sm:$0xff]  ;;  %v225_v35 = vld [vmem:[#allocation6 + $0xa0] sm:$0xff] }
  0x40   :  { %477 = vmatpush.msrb.mxu1 %v230_v33  ;;  %v157_v33 = vld [vmem:[#allocation4] sm:$0xff] }
  0x41   :  { %373 = vmatpush.msrb.mxu0 %v116_v24  ;;  %356 = vmatpush.msra.mxu3 %v85_v39  ;;  %v208_v24 = vld [vmem:[#allocation6 + $0x18] sm:$0xff]  ;;  %v194_v39 = vld [vmem:[#allocation4 + $0x128] sm:$0xff] }
  0x42   :  { %478 = vmatpush.msrb.mxu1 %v227_v36  ;;  %v197_v36 = vld [vmem:[#allocation4 + $0x140] sm:$0xff] }
  0x43   :  { %374 = vmatpush.msrb.mxu0 %v111_v27  ;;  %357 = vmatpush.msra.mxu3 %v80_v43  ;;  %v206_v27 = vld [vmem:[#allocation6 + $0x8] sm:$0xff]  ;;  %v192_v43 = vld [vmem:[#allocation4 + $0x118] sm:$0xff] }
  0x44   :  { %479 = vmatpush.msrb.mxu1 %v224_v40  ;;  %358 = vmatmul.f32.vlgmr.msra.gmra.mxu3 %v869_v41  ;;  %v195_v40 = vld [vmem:[#allocation4 + $0x130] sm:$0xff] }
  0x45   :  { %375 = vmatpush.msrb.mxu0 %v106_v31  ;;  %447 = vmatpush.msrb.mxu3 %v250_v46  ;;  %v201_v31 = vld [vmem:[#allocation4 + $0x160] sm:$0xff]  ;;  %v219_v46 = vld [vmem:[#allocation6 + $0x70] sm:$0xff] }
  0x46   :  { %480 = vmatpush.msrb.mxu1 %v221_v44  ;;  %v188_v44 = vld [vmem:[#allocation4 + $0xf8] sm:$0xff] }
  0x47   :  { %376 = vmatpush.msrb.mxu0 %v101_v34  ;;  %448 = vmatpush.msrb.mxu3 %v247_v50  ;;  %v228_v34 = vld [vmem:[#allocation6 + $0xb8] sm:$0xff]  ;;  %v213_v50 = vld [vmem:[#allocation6 + $0x40] sm:$0xff] }
  0x48   :  { %481 = vmatpush.msrb.mxu1 %v218_v49  ;;  %v216_v49 = vld [vmem:[#allocation6 + $0x58] sm:$0xff] }
  0x49   :  { %377 = vmatpush.msrb.mxu0 %v96_v38  ;;  %v222_v38 = vld [vmem:[#allocation6 + $0x88] sm:$0xff] }
  0x4b   :  { %378 = vmatpush.msrb.mxu0 %v91_v42  ;;  %v191_v42 = vld [vmem:[#allocation4 + $0x110] sm:$0xff] }
  0x4c   :  { %361 = vmatmul.f32.gmra.mxu3 %v876_v47 }
  0x4d   :  { %379 = vmatpush.msrb.mxu0 %v86_v48 }
  0x4f   :  { %380 = vmatpush.msrb.mxu0 %v81_v51  ;;  %v185_v51 = vld [vmem:[#allocation4 + $0xe0] sm:$0xff] }
  0x50   :  { %381 = vmatmul.f32.vlgmr.msrb.gmra.mxu0 %v869_v41 }
  0x51   :  { %516 = vmatpush.msra.mxu0 %v202_v55  ;;  %v182_v55 = vld [vmem:[#allocation4 + $0xc8] sm:$0xff] }
  0x58   :  { %384 = vmatmul.f32.gmra.mxu0 %v876_v47 }
  0xab   :  { %v290_v52 = vpop.f32.mrf.mxu0 }
  0xac   :  { %v313_v53 = vpop.f32.mrf.mxu1  ;;  %v291_v2 = vadd.f32 %v290_v52, %v263_v57  ;;  %v215_v52 = vld [vmem:[#allocation6 + $0x50] sm:$0xff] }
  0xad   :  { %v314_v7 = vadd.f32 %v313_v53, %v264_v58  ;;  %v244_v53 = vld [vmem:[#allocation6 + $0x138] sm:$0xff]  ;;  %482 = vmatpush.msrb.mxu1 %v215_v52  ;;  %v186_v52 = vld [vmem:[#allocation4 + $0xe8] sm:$0xff] }
  0xae   :  { %449 = vmatpush.msrb.mxu3 %v244_v53  ;;  %v210_v53 = vld [vmem:[#allocation6 + $0x28] sm:$0xff] }
  0xaf   :  { %483 = vmatpush.msrb.mxu1 %v212_v56  ;;  %v183_v56 = vld [vmem:[#allocation4 + $0xd0] sm:$0xff] }
  0xb1   :  { %484 = vmatpush.msrb.mxu1 %v209_v25  ;;  %v927_v25 = vld [vmem:[%s952_s6 + $0x3] ss:$8 sm:$0x7] }
  0xb3   :  { %v293_v59 = vpop.f32.mrf.mxu0  ;;  %485 = vmatpush.msrb.mxu1 %v206_v27  ;;  %v265_v27 = vperm.slane %v888_v54, 2 }
  0xb4   :  { %v294_v62 = vadd.f32 %v293_v59, %v263_v57  ;;  %v316_v63 = vpop.f32.mrf.mxu1  ;;  %v241_v57 = vld [vmem:[#allocation6 + $0x120] sm:$0xff]  ;;  %v238_v59 = vld [vmem:[#allocation6 + $0x108] sm:$0xff] }
  0xb5   :  { %v317_v3 = vadd.f32 %v316_v63, %v264_v58  ;;  %v199_v58 = vld [vmem:[#allocation4 + $0x150] sm:$0xff]  ;;  %450 = vmatpush.msrb.mxu3 %v241_v57  ;;  %v232_v63 = vld [vmem:[#allocation6 + $0xd8] sm:$0xff]  ;;  %562 = vmatpush.msra.mxu1 %v204_v29 }
  0xb6   :  { %409 = vmatpush.msrb.mxu2 %v294_v62  ;;  %517 = vmatpush.msra.mxu0 %v199_v58  ;;  %v193_v62 = vld [vmem:[#allocation4 + $0x120] sm:$0xff]  ;;  %v207_v57 = vld [vmem:[#allocation6 + $0x10] sm:$0xff] }
  0xb7   :  { %451 = vmatpush.msrb.mxu3 %v238_v59  ;;  %563 = vmatpush.msra.mxu1 %v201_v31  ;;  %v912_v48 = vpop.f32.mrf.mxu2  ;;  %v179_v58 = vld [vmem:[#allocation4 + $0xb0] sm:$0xff]  ;;  %v180_v59 = vld [vmem:[#allocation4 + $0xb8] sm:$0xff] }
  0xb8   :  { %410 = vmatpush.msrb.mxu2 %v291_v2  ;;  %518 = vmatpush.msra.mxu0 %v196_v60  ;;  %v187_v2 = vld [vmem:[#allocation4 + $0xf0] sm:$0xff]  ;;  %v176_v60 = vld [vmem:[#allocation4 + $0x98] sm:$0xff]  ;;  %v337_v31 = vadd.f32 %v912_v48, %v265_v27 }
  0xb9   :  { %699 = vmatmul.msk.f32.vlgmr.msrb.gmra.mxu2 %vm388_vm0, %v73_v4  ;;  %452 = vmatpush.msrb.mxu3 %v235_v61  ;;  %v184_v4 = vld [vmem:[#allocation4 + $0xd8] sm:$0xff]  ;;  %v177_v61 = vld [vmem:[#allocation4 + $0xa0] sm:$0xff] }
  0xba   :  { %438 = vmatpush.msra.mxu2 %v317_v3  ;;  %519 = vmatpush.msra.mxu0 %v193_v62  ;;  %v226_v3 = vld [vmem:[#allocation6 + $0xa8] sm:$0xff] }
  0xbb   :  { %453 = vmatpush.msrb.mxu3 %v232_v63  ;;  %v173_v63 = vld [vmem:[#allocation4 + $0x80] sm:$0xff] }
  0xbc   :  { %439 = vmatpush.msra.mxu2 %v314_v7  ;;  %520 = vmatpush.msra.mxu0 %v190_v0  ;;  %v220_v7 = vld [vmem:[#allocation6 + $0x78] sm:$0xff]  ;;  %v174_v0 = vld [vmem:[#allocation4 + $0x88] sm:$0xff] }
  0xbd   :  { %454 = vmatpush.msrb.mxu3 %v229_v1  ;;  %v170_v1 = vld [vmem:[#allocation4 + $0x68] sm:$0xff] }
  0xbe   :  { %493 = vmatpush.msrb.mxu2 %v252_v37  ;;  %521 = vmatpush.msra.mxu0 %v187_v2  ;;  %v198_v37 = vld [vmem:[#allocation4 + $0x148] sm:$0xff]  ;;  %v171_v2 = vld [vmem:[#allocation4 + $0x70] sm:$0xff] }
  0xbf   :  { %455 = vmatpush.msrb.mxu3 %v226_v3  ;;  %564 = vmatpush.msra.mxu1 %v198_v37  ;;  %v914_v62 = vpop.f32.mrf.mxu2  ;;  %v167_v3 = vld [vmem:[#allocation4 + $0x50] sm:$0xff] }
  0xc0   :  { %522 = vmatpush.msra.mxu0 %v184_v4  ;;  %494 = vmatpush.msrb.mxu2 %v249_v12  ;;  %v168_v4 = vld [vmem:[#allocation4 + $0x58] sm:$0xff] }
  0xc1   :  { %700 = vmatmul.msk.f32.gmra.mxu2 %vm388_vm0, %v74_v17  ;;  %456 = vmatpush.msrb.mxu3 %v223_v5  ;;  %v169_v17 = vld [vmem:[#allocation4 + $0x60] sm:$0xff]  ;;  %v164_v5 = vld [vmem:[#allocation4 + $0x38] sm:$0xff] }
  0xc2   :  { %523 = vmatpush.msra.mxu0 %v181_v6  ;;  %495 = vmatpush.msrb.mxu2 %v246_v14  ;;  %v165_v6 = vld [vmem:[#allocation4 + $0x40] sm:$0xff] }
  0xc3   :  { %457 = vmatpush.msrb.mxu3 %v220_v7  ;;  %565 = vmatpush.msra.mxu1 %v195_v40  ;;  %v161_v7 = vld [vmem:[#allocation4 + $0x20] sm:$0xff] }
  0xc4   :  { %524 = vmatpush.msra.mxu0 %v178_v11  ;;  %496 = vmatpush.msrb.mxu2 %v243_v16  ;;  %v159_v11 = vld [vmem:[#allocation4 + $0x10] sm:$0xff]  ;;  %v257_v16 = vld [vmem:[%s952_s6 + $0x2] ss:$0 sm:$0xff] }
  0xc5   :  { %458 = vmatpush.msrb.mxu3 %v217_v8  ;;  %566 = vmatpush.msra.mxu1 %v192_v43  ;;  %v162_v8 = vld [vmem:[#allocation4 + $0x28] sm:$0xff] }
  0xc6   :  { %525 = vmatpush.msra.mxu0 %v175_v13  ;;  %497 = vmatpush.msrb.mxu2 %v240_v18 }
  0xc7   :  { %459 = vmatpush.msrb.mxu3 %v214_v9  ;;  %v256_v9 = vld [vmem:[%s952_s6 + $0x1] ss:$0 sm:$0xff] }
  0xc8   :  { %526 = vmatpush.msra.mxu0 %v172_v15  ;;  %498 = vmatpush.msrb.mxu2 %v237_v20 }
  0xc9   :  { %701 = vmatmul.msk.f32.vlgmr.msra.gmra.mxu2 %vm388_vm0, %v75_v30  ;;  %460 = vmatpush.msrb.mxu3 %v211_v10  ;;  %v200_v30 = vld [vmem:[#allocation4 + $0x158] sm:$0xff]  ;;  %v158_v10 = vld [vmem:[#allocation4 + $0x8] sm:$0xff] }
  0xca   :  { %527 = vmatpush.msra.mxu0 %v169_v17  ;;  %499 = vmatpush.msrb.mxu2 %v234_v22  ;;  %v359_v22 = vpop.f32.mrf.mxu3 }
  0xcb   :  { %461 = vmatpush.msrb.mxu3 %v208_v24 }
  0xcc   :  { %528 = vmatpush.msra.mxu0 %v166_v19  ;;  %500 = vmatpush.msrb.mxu2 %v231_v32 }
  0xcd   :  { %462 = vmatpush.msrb.mxu3 %v205_v26 }
  0xce   :  { %529 = vmatpush.msra.mxu0 %v163_v21  ;;  %501 = vmatpush.msrb.mxu2 %v228_v34  ;;  %v382_v21 = vpop.f32.mrf.mxu0 }
  0xcf   :  { %539 = vmatpush.msra.mxu3 %v203_v28  ;;  %v586_v28 = vperm.slane %v927_v25, 0 }
  0xd0   :  { %530 = vmatpush.msra.mxu0 %v160_v23  ;;  %502 = vmatpush.msrb.mxu2 %v225_v35 }
  0xd1   :  { %702 = vmatmul.msk.f32.gmra.mxu2 %vm388_vm0, %v76_v45  ;;  %540 = vmatpush.msra.mxu3 %v200_v30  ;;  %v189_v45 = vld [vmem:[#allocation4 + $0x100] sm:$0xff] }
  0xd2   :  { %531 = vmatpush.msra.mxu0 %v157_v33  ;;  %503 = vmatpush.msrb.mxu2 %v222_v38  ;;  %v362_v24 = vpop.f32.mrf.mxu3 }
  0xd3   :  { %541 = vmatpush.msra.mxu3 %v197_v36  ;;  %567 = vmatpush.msra.mxu1 %v189_v45 }
  0xd4   :  { %504 = vmatpush.msrb.mxu2 %v219_v46  ;;  %v587_v46 = vperm.slane %v927_v25, 1 }
  0xd5   :  { %542 = vmatpush.msra.mxu3 %v194_v39  ;;  %568 = vmatpush.msra.mxu1 %v186_v52  ;;  %v340_v39 = vadd.f32 %v914_v62, %v265_v27 }
  0xd6   :  { %505 = vmatpush.msrb.mxu2 %v216_v49  ;;  %v922_v23 = vpop.f32.mrf.mxu0 }
  0xd7   :  { %543 = vmatpush.msra.mxu3 %v191_v42  ;;  %569 = vmatpush.msra.mxu1 %v183_v56 }
  0xd8   :  { %506 = vmatpush.msrb.mxu2 %v213_v50 }
  0xd9   :  { %544 = vmatpush.msra.mxu3 %v188_v44  ;;  %570 = vmatpush.msra.mxu1 %v180_v59  ;;  %v266_v44 = vperm.slane %v888_v54, 3 }
  0xda   :  { %507 = vmatpush.msrb.mxu2 %v210_v53 }
  0xdb   :  { %545 = vmatpush.msra.mxu3 %v185_v51  ;;  %571 = vmatpush.msra.mxu1 %v177_v61  ;;  %v360_v52 = vadd.f32 %v359_v22, %v266_v44 }
  0xdc   :  { %508 = vmatpush.msrb.mxu2 %v207_v57 }
  0xdd   :  { %546 = vmatpush.msra.mxu3 %v182_v55  ;;  %572 = vmatpush.msra.mxu1 %v174_v0  ;;  %v363_v0 = vadd.f32 %v362_v24, %v266_v44 }
  0xdf   :  { %547 = vmatpush.msra.mxu3 %v179_v58  ;;  %573 = vmatpush.msra.mxu1 %v171_v2 }
  0xe1   :  { %548 = vmatpush.msra.mxu3 %v176_v60  ;;  %574 = vmatpush.msra.mxu1 %v168_v4 }
  0xe3   :  { %549 = vmatpush.msra.mxu3 %v173_v63  ;;  %575 = vmatpush.msra.mxu1 %v165_v6 }
  0xe5   :  { %550 = vmatpush.msra.mxu3 %v170_v1  ;;  %576 = vmatpush.msra.mxu1 %v162_v8 }
  0xe7   :  { %551 = vmatpush.msra.mxu3 %v167_v3  ;;  %577 = vmatpush.msra.mxu1 %v159_v11  ;;  %v267_v3 = vperm.slane %v888_v54, 4 }
  0xe9   :  { %552 = vmatpush.msra.mxu3 %v164_v5 }
  0xeb   :  { %553 = vmatpush.msra.mxu3 %v161_v7 }
  0xed   :  { %554 = vmatpush.msra.mxu3 %v158_v10 }
 0x13c   :  { %v412_v12 = vpop.f32.mrf.mxu2 }
 0x13d   :  { %v413_v13 = vadd.f32 %v412_v12, %v256_v9 }
 0x13f   :  { %532 = vmatmul.f32.vlgmr.msra.gmra.mxu0 %v413_v13 }
 0x144   :  { %v415_v14 = vpop.f32.mrf.mxu2 }
 0x145   :  { %v416_v15 = vadd.f32 %v415_v14, %v256_v9  ;;  %v588_v9 = vperm.slane %v927_v25, 2 }
 0x147   :  { %535 = vmatmul.f32.gmra.mxu0 %v416_v15 }
 0x14c   :  { %v441_v17 = vpop.f32.mrf.mxu2 }
 0x14d   :  { %v442_v18 = vadd.f32 %v441_v17, %v257_v16 }
 0x14f   :  { %463 = vmatmul.f32.vlgmr.msrb.gmra.mxu3 %v442_v18  ;;  %486 = vmatmul.f32.vlgmr.msrb.gmra.mxu1 %v442_v18 }
 0x150   :  { %509 = vmatmul.f32.vlgmr.msrb.gmra.mxu2 %v442_v18 }
 0x154   :  { %v444_v19 = vpop.f32.mrf.mxu2 }
 0x155   :  { %v445_v20 = vadd.f32 %v444_v19, %v257_v16 }
 0x157   :  { %466 = vmatmul.f32.gmra.mxu3 %v445_v20  ;;  %489 = vmatmul.f32.gmra.mxu1 %v445_v20 }
 0x158   :  { %512 = vmatmul.f32.gmra.mxu2 %v445_v20 }
 0x15f   :  { %555 = vmatmul.f32.vlgmr.msra.gmra.mxu3 %v413_v13  ;;  %578 = vmatmul.f32.vlgmr.msra.gmra.mxu1 %v413_v13 }
 0x167   :  { %558 = vmatmul.f32.gmra.mxu3 %v416_v15  ;;  %581 = vmatmul.f32.gmra.mxu1 %v416_v15  ;;  %v383_v15 = vadd.f32 %v382_v21, %v267_v3 }
 0x1bc   :  { %v533_v26 = vpop.f32.mrf.mxu0 }
 0x1c4   :  { %v536_v36 = vpop.f32.mrf.mxu0 }
 0x1cc   :  { %v487_v34 = vpop.f32.mrf.mxu1 }
 0x1d2   :  { %v464_v29 = vpop.f32.mrf.mxu3 }
 0x1d3   :  { %v534_v30 = vadd.f32 %v533_v26, %v464_v29  ;;  %v510_v4 = vpop.f32.mrf.mxu2 }
 0x1d4   :  { %v490_v48 = vpop.f32.mrf.mxu1 }
 0x1d5   :  { %v592_v32 = vadd.f32 %v586_v28, %v534_v30 }
 0x1d7   :  { %v598_v33 = vadd.f32 %v592_v32, %v337_v31 }
 0x1d9   :  { %v703_v35 = vmul.f32 -1.442695, %v598_v33 }
 0x1da   :  { %v467_v37 = vpop.f32.mrf.mxu3 }
 0x1db   :  { %714 = vpow2.f32 %v703_v35  ;;  %v537_v38 = vadd.f32 %v536_v36, %v467_v37  ;;  %v513_v30 = vpop.f32.mrf.mxu2  ;;  %v386_v36 = vadd.f32 %v922_v23, %v267_v3 }
 0x1dc   :  { %v579_v63 = vpop.f32.mrf.mxu1 }
 0x1dd   :  { %v595_v40 = vadd.f32 %v586_v28, %v537_v38  ;;  %v580_v11 = vadd.f32 %v579_v63, %v510_v4 }
 0x1df   :  { %v599_v42 = vadd.f32 %v595_v40, %v340_v39  ;;  %v594_v20 = vadd.f32 %v588_v9, %v580_v11 }
 0x1e1   :  { %v715_v43 = vpop.eup %714  ;;  %v704_v45 = vmul.f32 -1.442695, %v599_v42 }
 0x1e2   :  { %v606_v49 = vadd.f32 1.0, %v715_v43  ;;  %v556_v50 = vpop.f32.mrf.mxu3 }
 0x1e3   :  { %716 = vpow2.f32 %v704_v45  ;;  %v557_v51 = vadd.f32 %v556_v50, %v487_v34 }
 0x1e4   :  { %718 = vrcp.f32 %v606_v49  ;;  %v619_v5 = vand.u32 2147483648, %v606_v49  ;;  %v617_v7 = vand.u32 2147483647, %v606_v49  ;;  %vm613_vm2 = vweird.f32 %v606_v49  ;;  %v582_v25 = vpop.f32.mrf.mxu1 }
 0x1e5   :  { %v593_v53 = vadd.f32 %v587_v46, %v557_v51  ;;  %v583_v31 = vadd.f32 %v582_v25, %v513_v30 }
 0x1e6   :  { %v620_v16 = vor.u32 1.1754944e-38, %v619_v5  ;;  %vm618_vm4 = vcmp.eq.f32.partialorder %v617_v7, 8.507059e+37 }
 0x1e7   :  { %v638_v55 = vadd.f32 %v593_v53, %v360_v52  ;;  %v597_v42 = vadd.f32 %v588_v9, %v583_v31 }
 0x1e9   :  { %v717_v56 = vpop.eup %716  ;;  %v705_v57 = vmul.f32 -1.442695, %v638_v55 }
 0x1ea   :  { %v719_v58 = vpop.eup %718  ;;  %v607_v59 = vadd.f32 1.0, %v717_v56  ;;  %v559_v60 = vpop.f32.mrf.mxu3 }
 0x1eb   :  { %v609_v61 = vmul.f32 %v719_v58, %v606_v49  ;;  %720 = vpow2.f32 %v705_v57  ;;  %v560_v62 = vadd.f32 %v559_v60, %v490_v48  ;;  %vm614_vm1 = vweird.f32 %v719_v58 }
 0x1ec   :  { %722 = vrcp.f32 %v607_v59  ;;  %vm615_vm3 = vmor %vm613_vm2, %vm614_vm1  ;;  %v634_v26 = vand.u32 2147483648, %v607_v59  ;;  %v632_v29 = vand.u32 2147483647, %v607_v59  ;;  %vm628_vm6 = vweird.f32 %v607_v59 }
 0x1ed   :  { %v610_v1 = vsub.f32 1.0, %v609_v61  ;;  %v596_v2 = vadd.f32 %v587_v46, %v560_v62 }
 0x1ee   :  { %v635_v34 = vor.u32 1.1754944e-38, %v634_v26  ;;  %vm633_vm8 = vcmp.eq.f32.partialorder %v632_v29, 8.507059e+37 }
 0x1ef   :  { %v611_v6 = vmul.f32 %v719_v58, %v610_v1  ;;  %v639_v8 = vadd.f32 %v596_v2, %v363_v0 }
 0x1f1   :  { %v721_v10 = vpop.eup %720  ;;  %v612_v12 = vadd.f32 %v719_v58, %v611_v6  ;;  %v706_v13 = vmul.f32 -1.442695, %v639_v8 }
 0x1f2   :  { %v723_v14 = vpop.eup %722  ;;  %v646_v17 = vadd.f32 1.0, %v721_v10 }
 0x1f3   :  { %v616_v18 = vsel %vm615_vm3, %v719_v58, %v612_v12  ;;  %v624_v54 = vmul.f32 %v723_v14, %v607_v59  ;;  %724 = vpow2.f32 %v706_v13  ;;  %vm629_vm5 = vweird.f32 %v723_v14 }
 0x1f4   :  { %v621_v19 = vsel %vm618_vm4, %v620_v16, %v616_v18  ;;  %726 = vrcp.f32 %v646_v17  ;;  %vm630_vm7 = vmor %vm628_vm6, %vm629_vm5  ;;  %v659_v44 = vand.u32 2147483648, %v646_v17  ;;  %v657_v46 = vand.u32 2147483647, %v646_v17 }
 0x1f5   :  { %v678_v22 = vmul.f32 %v621_v19, %v383_v15  ;;  %v625_v24 = vsub.f32 1.0, %v624_v54  ;;  %vm653_vm10 = vweird.f32 %v646_v17 }
 0x1f6   :  { %v660_v52 = vor.u32 1.1754944e-38, %v659_v44  ;;  %vm658_vm12 = vcmp.eq.f32.partialorder %v657_v46, 8.507059e+37 }
 0x1f7   :  { %v680_v27 = vadd.f32 %v678_v22, %v594_v20  ;;  %v626_v28 = vmul.f32 %v723_v14, %v625_v24 }
 0x1f9   :  { %v725_v21 = vpop.eup %724  ;;  %v627_v32 = vadd.f32 %v723_v14, %v626_v28  ;;  %728 = vtanh.f32 %v680_v27 }
 0x1fa   :  { %v727_v33 = vpop.eup %726  ;;  %v647_v35 = vadd.f32 1.0, %v725_v21 }
 0x1fb   :  { %v649_v37 = vmul.f32 %v727_v33, %v646_v17  ;;  %v631_v38 = vsel %vm630_vm7, %v723_v14, %v627_v32  ;;  %vm654_vm9 = vweird.f32 %v727_v33 }
 0x1fc   :  { %v636_v39 = vsel %vm633_vm8, %v635_v34, %v631_v38  ;;  %730 = vrcp.f32 %v647_v35  ;;  %vm655_vm11 = vmor %vm653_vm10, %vm654_vm9  ;;  %v674_v59 = vand.u32 2147483648, %v647_v35  ;;  %v672_v62 = vand.u32 2147483647, %v647_v35 }
 0x1fd   :  { %v650_v40 = vsub.f32 1.0, %v649_v37  ;;  %v679_v43 = vmul.f32 %v636_v39, %v386_v36  ;;  %vm668_vm14 = vweird.f32 %v647_v35 }
 0x1fe   :  { %vm673_vm0 = vcmp.eq.f32.partialorder %v672_v62, 8.507059e+37 }
 0x1ff   :  { %v651_v45 = vmul.f32 %v727_v33, %v650_v40  ;;  %v681_v49 = vadd.f32 %v679_v43, %v597_v42  ;;  %v729_v48 = vpop.eup %728 }
 0x200   :  { %v684_v23 = vsub.f32 %v869_v41, %v729_v48  ;;  %v675_v41 = vor.u32 1.1754944e-38, %v674_v59 }
 0x201   :  { %v652_v50 = vadd.f32 %v727_v33, %v651_v45  ;;  %732 = vtanh.f32 %v681_v49 }
 0x202   :  { %v731_v51 = vpop.eup %730 }
 0x203   :  { %v656_v53 = vsel %vm655_vm11, %v727_v33, %v652_v50  ;;  %v664_v55 = vmul.f32 %v731_v51, %v647_v35  ;;  %vm669_vm13 = vweird.f32 %v731_v51 }
 0x204   :  { %v661_v56 = vsel %vm658_vm12, %v660_v52, %v656_v53  ;;  %vm670_vm15 = vmor %vm668_vm14, %vm669_vm13 }
 0x205   :  { %v686_v57 = vmul.f32 %v684_v23, %v661_v56  ;;  %v665_v58 = vsub.f32 1.0, %v664_v55 }
 0x207   :  { %v688_v60 = vadd.f32 %v729_v48, %v686_v57  ;;  %v666_v61 = vmul.f32 %v731_v51, %v665_v58  ;;  %v733_v63 = vpop.eup %732 }
 0x208   :  { %v685_v1 = vsub.f32 %v876_v47, %v733_v63 }
 0x209   :  { %690 = vst [vmem:[%s953_s7] sm:$0xff] %v688_v60  ;;  %v667_v0 = vadd.f32 %v731_v51, %v666_v61 }
 0x20b   :  { %v671_v2 = vsel %vm670_vm15, %v731_v51, %v667_v0 }
 0x20c   :  { %v676_v3 = vsel %vm673_vm0, %v675_v41, %v671_v2 }
 0x20d   :  { %v687_v4 = vmul.f32 %v685_v1, %v676_v3 }
 0x20f   :  { %v689_v5 = vadd.f32 %v733_v63, %v687_v4 }
 0x211   :  { %691 = vst [vmem:[%s953_s7 + $0x8] sm:$0xff] %v689_v5 }
 0x212   :  { %696 = vsyncpa [#allocation3], 1 }
 0x213   :  { %697 = vsyncpa [#allocation5], 1 }

</bundles_post_ra>
